<compile_context>
chip_gen: v7x
topology: tpu7x:2x2x1
jax: 0.10.0
libtpu: 0.0.40
codegen_flags: <defaults>
</compile_context>

<pallas_src>
import numpy as np
import jax
import jax.numpy as jnp
from jax import lax
from jax.experimental import pallas as pl
from jax.experimental.pallas import tpu as pltpu


def _round_up(x, m):
    return (x + m - 1) // m * m


def _vmem_limit(need_bytes):
    # Explicit scoped-VMEM budget: computed block need + headroom, floored at
    # the cross-generation default (32 MiB) and capped at v7x's 64 MiB physical.
    return int(min(max(need_bytes + (8 << 20), 32 << 20), 64 << 20))


# ----------------------------------------------------------------------------
# Tiled Linear kernel: (N, K) @ (K, V) + b.  Used for the per-layer LSTM input
# projection (whole sequence at once) and the final vocab projection.
# Activations are cast to the (bf16) weight dtype inside the kernel; the MXU
# accumulates in f32.
# ----------------------------------------------------------------------------
def linear_kernel(x_ref, w_ref, b_ref, o_ref):
    x = x_ref[...].astype(w_ref.dtype)       # bf16 cast -> single-pass MXU
    acc = jnp.dot(x, w_ref[...], preferred_element_type=jnp.float32)
    o_ref[...] = (acc + b_ref[...]).astype(o_ref.dtype)


def linear_pallas(x, w_t, b_row, out_dtype=jnp.float32, tn=256, tv=512):
    """x: (N, K) f32, w_t: (K, V) pre-transposed bf16, b_row: (1, V) f32 -> (N, V)."""
    N, K = x.shape
    V = w_t.shape[1]
    tn = min(tn, _round_up(N, 8))
    tv = min(tv, _round_up(V, 128))
    N_pad = _round_up(N, tn)
    V_pad = _round_up(V, tv)
    if N_pad != N:
        x = jnp.pad(x, ((0, N_pad - N), (0, 0)))
    if V_pad != V:
        w_t = jnp.pad(w_t, ((0, 0), (0, V_pad - V)))
        b_row = jnp.pad(b_row, ((0, 0), (0, V_pad - V)))

    x_bytes = N_pad * K * x.dtype.itemsize
    w_bytes = K * V_pad * w_t.dtype.itemsize
    # Keep the larger operand resident across the inner (fast) grid axis so it
    # is read from HBM only once; re-read the smaller one.
    weight_stationary = w_bytes >= x_bytes

    if weight_stationary:
        grid = (V_pad // tv, N_pad // tn)             # inner axis = N tiles
        x_map = lambda vj, ni: (ni, 0)
        w_map = lambda vj, ni: (0, vj)
        b_map = lambda vj, ni: (0, vj)
        o_map = lambda vj, ni: (ni, vj)
    else:
        grid = (N_pad // tn, V_pad // tv)             # inner axis = V tiles
        x_map = lambda ni, vj: (ni, 0)
        w_map = lambda ni, vj: (0, vj)
        b_map = lambda ni, vj: (0, vj)
        o_map = lambda ni, vj: (ni, vj)

    need = 2 * (tn * K * x.dtype.itemsize
                + K * tv * w_t.dtype.itemsize
                + tv * b_row.dtype.itemsize
                + tn * tv * jnp.dtype(out_dtype).itemsize)

    out = pl.pallas_call(
        linear_kernel,
        out_shape=jax.ShapeDtypeStruct((N_pad, V_pad), out_dtype),
        grid=grid,
        in_specs=[pl.BlockSpec((tn, K), x_map),
                  pl.BlockSpec((K, tv), w_map),
                  pl.BlockSpec((1, tv), b_map)],
        out_specs=pl.BlockSpec((tn, tv), o_map),
        compiler_params=pltpu.CompilerParams(
            dimension_semantics=("parallel", "parallel"),
            vmem_limit_bytes=_vmem_limit(need)),
    )(x, w_t, b_row)
    return out[:N, :V]


# ----------------------------------------------------------------------------
# LSTM recurrence kernel (one layer).  Input gates xw = X @ Wih^T + (b_ih+b_hh)
# are precomputed for ALL timesteps (bf16), so per step only h @ Whh^T +
# elementwise remains.  Grid = (batch tiles ["parallel"], time chunks
# ["arbitrary"]); h/c are carried in f32 VMEM scratch; Whh is bf16 and
# single-buffered (constant block).
# ----------------------------------------------------------------------------
def make_lstm_rec_kernel(Tc, H):
    def kernel(xw_ref, whh_ref, out_ref, h_ref, c_ref):
        @pl.when(pl.program_id(1) == 0)     # first time-chunk of this batch tile
        def _init():
            h_ref[...] = jnp.zeros_like(h_ref)
            c_ref[...] = jnp.zeros_like(c_ref)

        whh = whh_ref[...]                  # (H_pad, 4*H_pad) bf16, resident

        def step(tt, carry):
            gates = (xw_ref[tt].astype(jnp.float32)
                     + jnp.dot(h_ref[...].astype(jnp.bfloat16), whh,
                               preferred_element_type=jnp.float32))
            # PyTorch gate order i, f, g, o; H multiple of 128 so these slices
            # are lane-aligned slabs (pure VPU/EUP, no relayout).
            i = jax.nn.sigmoid(gates[:, 0 * H:1 * H])
            f = jax.nn.sigmoid(gates[:, 1 * H:2 * H])
            g = jnp.tanh(gates[:, 2 * H:3 * H])
            o = jax.nn.sigmoid(gates[:, 3 * H:4 * H])
            c_new = f * c_ref[...] + i * g
            h_new = o * jnp.tanh(c_new)
            c_ref[...] = c_new
            h_ref[...] = h_new
            out_ref[tt] = h_new
            return carry

        # TODO(synk): drop to unroll=2/4 if bundle dumps show vreg spills at H_pad>=1024.
        lax.fori_loop(0, Tc, step, 0, unroll=True)

    return kernel


def lstm_recurrence_pallas(xw, whh_t, Tc):
    """xw: (T1_pad, B_pad, 4*H_pad) bf16 precomputed gates; whh_t: (H_pad, 4*H_pad) bf16."""
    T1p, Bp, G = xw.shape
    Hp = G // 4
    # Batch-tile axis lets v7x's 2 TensorCores split independent rows when the
    # batch is large enough; a single tile (no-op) for small batches.
    Bt = Bp if Bp < 16 else _round_up(Bp // 2, 8)
    kernel = make_lstm_rec_kernel(Tc, Hp)
    need = (2 * Tc * Bt * G * xw.dtype.itemsize           # xw, double-buffered
            + Hp * G * whh_t.dtype.itemsize               # whh, single-buffered
            + 2 * Tc * Bt * Hp * 4                        # out, double-buffered
            + 2 * Bt * Hp * 4)                            # h/c scratch
    return pl.pallas_call(
        kernel,
        out_shape=jax.ShapeDtypeStruct((T1p, Bp, Hp), jnp.float32),
        grid=(Bp // Bt, T1p // Tc),
        in_specs=[pl.BlockSpec((Tc, Bt, G), lambda b, t: (t, b, 0)),
                  # Constant block -> single buffer: never allocate a second
                  # (Hp, 4Hp) copy (key VMEM saver on v5e / v7x at large H).
                  pl.BlockSpec((Hp, G), lambda b, t: (0, 0),
                               pipeline_mode=pl.Buffered(1))],
        out_specs=pl.BlockSpec((Tc, Bt, Hp), lambda b, t: (t, b, 0)),
        scratch_shapes=[pltpu.VMEM((Bt, Hp), jnp.float32),
                        pltpu.VMEM((Bt, Hp), jnp.float32)],
        compiler_params=pltpu.CompilerParams(
            dimension_semantics=("parallel", "arbitrary"),  # time must stay sequential
            vmem_limit_bytes=_vmem_limit(need)),
    )(xw, whh_t)


# ----------------------------------------------------------------------------
# One-time parameter preparation: transpose + pad to (8, 128) granularity,
# gate-blocked so padded lanes are zero inside each of the i/f/g/o blocks,
# and cast matmul weights to bf16 (f32 accumulation happens in the kernels).
# ----------------------------------------------------------------------------
def _pad_gate_weight_t(w, H, H_pad, in_dim, in_pad):
    # w: (4H, in_dim) torch layout (gate blocks i,f,g,o stacked along dim 0)
    # -> (in_pad, 4*H_pad) bf16, pre-transposed, gate-blocked padding.
    w_t = w.T.reshape(in_dim, 4, H)
    out = jnp.zeros((in_pad, 4, H_pad), jnp.float32)
    out = out.at[:in_dim, :, :H].set(w_t)
    return out.reshape(in_pad, 4 * H_pad).astype(jnp.bfloat16)


def _pad_gate_bias(b, H, H_pad):
    # b: (1, 4H) (already b_ih + b_hh) -> (1, 4*H_pad) gate-blocked, f32.
    b4 = b.reshape(4, H)
    out = jnp.zeros((4, H_pad), jnp.float32)
    out = out.at[:, :H].set(b4)
    return out.reshape(1, 4 * H_pad)


def prepare_params(params, embed_size, hidden_size, lane_mult=128):
    # TODO(synk): use lane_mult=256 on v6e/v7x when E/H are odd multiples of 128
    # (2x256x256 MXU partial-tile occupancy); 128 is already optimal on v5e.
    E_pad = _round_up(embed_size, lane_mult)
    H_pad = _round_up(hidden_size, lane_mult)
    lstm_prepped = []
    for layer, (wih, whh, bias) in enumerate(params['lstm']):
        in_dim = wih.shape[1]
        in_pad = E_pad if layer == 0 else H_pad
        wih_t = _pad_gate_weight_t(wih, hidden_size, H_pad, in_dim, in_pad)
        whh_t = _pad_gate_weight_t(whh, hidden_size, H_pad, hidden_size, H_pad)
        b_row = _pad_gate_bias(bias, hidden_size, H_pad)
        lstm_prepped.append((wih_t, whh_t, b_row))
    V = params['linear_w'].shape[0]
    lw_t = jnp.zeros((H_pad, V), jnp.float32).at[:hidden_size, :].set(
        params['linear_w'].T).astype(jnp.bfloat16)
    lb = params['linear_b'].reshape(1, V).astype(jnp.float32)
    return {'embed': params['embed'], 'lstm': lstm_prepped,
            'linear_w_t': lw_t, 'linear_b': lb,
            'E_pad': E_pad, 'H_pad': H_pad}


# ----------------------------------------------------------------------------
# Full DecoderRNN.forward
# ----------------------------------------------------------------------------
def decoder_rnn_forward(prepped, features, captions, lengths, Tc=4):
    """lengths: python list of ints, sorted descending (pack_padded_sequence
    with enforce_sorted=True semantics, lengths[b] <= T+1)."""
    # TODO(synk): in serving, bucket `lengths` / batch multiple requests (B_pad
    # 8 -> 64/128 rides the Whh stream for free) instead of retracing per shape.
    B, T = captions.shape
    T1 = T + 1
    E = features.shape[1]
    E_pad, H_pad = prepped['E_pad'], prepped['H_pad']
    B_pad = _round_up(B, 8)
    T1_pad = _round_up(T1, Tc)

    # Embedding gather + feature concat (XLA glue), then time-major + padding.
    emb = jnp.take(prepped['embed'], captions, axis=0)            # (B, T, E)
    seq = jnp.concatenate([features[:, None, :], emb], axis=1)    # (B, T1, E)
    x = jnp.transpose(seq, (1, 0, 2))                             # (T1, B, E)
    x = jnp.pad(x, ((0, T1_pad - T1), (0, B_pad - B), (0, E_pad - E)))

    # Stacked LSTM, layer by layer: big batched input projection (bf16 xw to
    # halve its HBM round trip) + small serial recurrence.
    for (wih_t, whh_t, b_row) in prepped['lstm']:
        in_dim = x.shape[2]
        xw = linear_pallas(x.reshape(T1_pad * B_pad, in_dim), wih_t, b_row,
                           out_dtype=jnp.bfloat16)
        xw = xw.reshape(T1_pad, B_pad, 4 * H_pad)
        x = lstm_recurrence_pallas(xw, whh_t, Tc)                  # (T1_pad, B_pad, H_pad)

    # pack_padded_sequence data order: time-major, batch within each step.
    # Flat single-axis gather (cheaper lowering than 2-D coordinate gather).
    flat = x.reshape(T1_pad * B_pad, H_pad)
    pack_idx = []
    for t in range(max(lengths)):
        for b in range(B):
            if lengths[b] > t:
                pack_idx.append(t * B_pad + b)
    packed = jnp.take(flat, jnp.array(pack_idx, dtype=jnp.int32), axis=0)

    # Final vocab projection (weight-stationary tiled Pallas linear, f32 out).
    return linear_pallas(packed, prepped['linear_w_t'], prepped['linear_b'],
                         out_dtype=jnp.float32)


# ----------------------------------------------------------------------------
# Deterministic parameter init (shapes match the nn.Module __init__).
# ----------------------------------------------------------------------------
def init_params(key, vocab_size, embed_size, hidden_size, num_layers):
    keys = iter(jax.random.split(key, 3 + 4 * num_layers))
    s = 0.1
    embed = s * jax.random.normal(next(keys), (vocab_size, embed_size), jnp.float32)
    lstm = []
    for layer in range(num_layers):
        in_dim = embed_size if layer == 0 else hidden_size
        wih = s * jax.random.normal(next(keys), (4 * hidden_size, in_dim), jnp.float32)
        whh = s * jax.random.normal(next(keys), (4 * hidden_size, hidden_size), jnp.float32)
        b_ih = s * jax.random.normal(next(keys), (4 * hidden_size,), jnp.float32)
        b_hh = s * jax.random.normal(next(keys), (4 * hidden_size,), jnp.float32)
        lstm.append((wih, whh, (b_ih + b_hh).reshape(1, 4 * hidden_size)))
    linear_w = s * jax.random.normal(next(keys), (vocab_size, hidden_size), jnp.float32)
    linear_b = s * jax.random.normal(next(keys), (vocab_size,), jnp.float32)
    return {'embed': embed, 'lstm': lstm, 'linear_w': linear_w, 'linear_b': linear_b}


# ----------------------------------------------------------------------------
# Pure-JAX f32 reference (mirrors torch semantics) for verification.
# ----------------------------------------------------------------------------
def reference_forward(params, features, captions, lengths):
    emb = jnp.take(params['embed'], captions, axis=0)
    seq = jnp.concatenate([features[:, None, :], emb], axis=1)
    B, T1, _ = seq.shape
    H = params['lstm'][0][1].shape[1]
    L = len(params['lstm'])
    h = [jnp.zeros((B, H), jnp.float32) for _ in range(L)]
    c = [jnp.zeros((B, H), jnp.float32) for _ in range(L)]
    top = []
    for t in range(T1):
        x = seq[:, t, :]
        for l, (wih, whh, b) in enumerate(params['lstm']):
            gates = x @ wih.T + h[l] @ whh.T + b
            i = jax.nn.sigmoid(gates[:, :H])
            f = jax.nn.sigmoid(gates[:, H:2 * H])
            g = jnp.tanh(gates[:, 2 * H:3 * H])
            o = jax.nn.sigmoid(gates[:, 3 * H:])
            c[l] = f * c[l] + i * g
            h[l] = o * jnp.tanh(c[l])
            x = h[l]
        top.append(x)
    hiddens = jnp.stack(top, axis=0)  # (T1, B, H)
    rows = []
    for t in range(max(lengths)):
        for b in range(B):
            if lengths[b] > t:
                rows.append(hiddens[t, b])
    packed = jnp.stack(rows, axis=0)
    return packed @ params['linear_w'].T + params['linear_b'][None, :]


if __name__ == "__main__":
    embed_size, hidden_size, vocab_size, num_layers = 16, 32, 64, 2
    B, T = 2, 8                      # captions are (B, T); sequence length is T+1
    lengths = [9, 7]                 # descending, <= T+1 (pack_padded_sequence order)

    key = jax.random.PRNGKey(0)
    k_feat, k_cap, k_param = jax.random.split(key, 3)
    params = init_params(k_param, vocab_size, embed_size, hidden_size, num_layers)
    features = jax.random.normal(k_feat, (B, embed_size), jnp.float32)
    captions = jax.random.randint(k_cap, (B, T), 0, vocab_size, dtype=jnp.int32)

    prepped = prepare_params(params, embed_size, hidden_size)
    out = decoder_rnn_forward(prepped, features, captions, lengths)
    out = jax.block_until_ready(out)

    ref = reference_forward(params, features, captions, lengths)
    assert out.shape == (sum(lengths), vocab_size), out.shape
    # bf16 weights / bf16 xw with f32 accumulation -> ~1e-3 level error vs the
    # pure-f32 reference; tolerance loosened accordingly.
    np.testing.assert_allclose(np.asarray(out), np.asarray(ref), rtol=2e-2, atol=2e-2)

    print("KERNEL_OK")
</pallas_src>

<mosaic_0001>
module attributes {stable_mosaic.version = 11 : i64} {
  func.func @linear_kernel(%arg0: i32, %arg1: i32, %arg2: memref<96x128xf32, #tpu.memory_space<vmem>>, %arg3: memref<128x512xbf16, #tpu.memory_space<vmem>>, %arg4: memref<1x512xf32, #tpu.memory_space<vmem>>, %arg5: memref<96x512xbf16, #tpu.memory_space<vmem>>) attributes {dimension_semantics = [#tpu.dimension_semantics<parallel>, #tpu.dimension_semantics<parallel>], iteration_bounds = array<i64: 1, 1>, scalar_prefetch = 0 : i64, scratch_operands = 0 : i64, tpu.core_type = #tpu.core_type<tc>, window_params = [{transform_indices = @transform_0, window_bounds = array<i64: 96, 128>}, {transform_indices = @transform_1, window_bounds = array<i64: 128, 512>}, {transform_indices = @transform_2, window_bounds = array<i64: 1, 512>}, {transform_indices = @transform_3, window_bounds = array<i64: 96, 512>}]} {
    %c0 = arith.constant 0 : index
    %c0_0 = arith.constant 0 : index
    %0 = vector.load %arg2[%c0, %c0_0] : memref<96x128xf32, #tpu.memory_space<vmem>>, vector<96x128xf32>
    %1 = arith.truncf %0 : vector<96x128xf32> to vector<96x128xbf16>
    %c0_1 = arith.constant 0 : index
    %c0_2 = arith.constant 0 : index
    %2 = vector.load %arg3[%c0_1, %c0_2] : memref<128x512xbf16, #tpu.memory_space<vmem>>, vector<128x512xbf16>
    %cst = arith.constant dense<0.000000e+00> : vector<96x512xf32>
    %3 = tpu.matmul %1, %2, %cst {dimension_numbers = #tpu.dot_dimension_numbers<[1], [0], [0], [1], [0, 0, 1, 1], [], []>} : vector<96x128xbf16>, vector<128x512xbf16>, vector<96x512xf32> -> vector<96x512xf32>
    %c0_3 = arith.constant 0 : index
    %c0_4 = arith.constant 0 : index
    %4 = vector.load %arg4[%c0_3, %c0_4] : memref<1x512xf32, #tpu.memory_space<vmem>>, vector<1x512xf32>
    %5 = vector.broadcast %4 : vector<1x512xf32> to vector<96x512xf32>
    %6 = arith.addf %3, %5 : vector<96x512xf32>
    %7 = arith.truncf %6 : vector<96x512xf32> to vector<96x512xbf16>
    %c0_5 = arith.constant 0 : index
    %c0_6 = arith.constant 0 : index
    %8 = vector.load %arg5[%c0_5, %c0_6] : memref<96x512xbf16, #tpu.memory_space<vmem>>, vector<96x512xbf16>
    tpu.vector_store %arg5[%c0_5, %c0_6], %7 {strides = array<i32>} : memref<96x512xbf16, #tpu.memory_space<vmem>>, vector<96x512xbf16>,
    return
  }
  func.func @transform_0(%arg0: i32, %arg1: i32) -> (i32, i32) {
    %c0_i32 = arith.constant 0 : i32
    %c0_i32_0 = arith.constant 0 : i32
    return %arg1, %c0_i32 : i32, i32
  }
  func.func @transform_1(%arg0: i32, %arg1: i32) -> (i32, i32) {
    %c0_i32 = arith.constant 0 : i32
    %c0_i32_0 = arith.constant 0 : i32
    return %c0_i32, %arg0 : i32, i32
  }
  func.func @transform_2(%arg0: i32, %arg1: i32) -> (i32, i32) {
    %c0_i32 = arith.constant 0 : i32
    %c0_i32_0 = arith.constant 0 : i32
    return %c0_i32, %arg0 : i32, i32
  }
  func.func @transform_3(%arg0: i32, %arg1: i32) -> (i32, i32) {
    %c0_i32 = arith.constant 0 : i32
    return %arg1, %arg0 : i32, i32
  }
}

</mosaic_0001>

<bundles_post_ra>
// kernel: tpu_custom_call.1
= control target key start
LH: loop header
LB: loop body
LE: loop exit
PB: predicated region body
PF: predicated region fallthrough
CT: control target
= control target key end

     0   :  { %8 = vsyncpa [#allocation3], 0  ;;  %s997_s0 = inlined_call_operand.hbm [shape: f32[96,128], index: 0, kind: input, shape index: {}]   ;;  %s998_s1 = inlined_call_operand.hbm [shape: bf16[128,512], index: 1, kind: input, shape index: {}]   ;;  %s999_s2 = inlined_call_operand.vmem [shape: f32[1,512], index: 2, kind: input, shape index: {}]   ;;  %s1000_s3 = inlined_call_operand.hbm [shape: bf16[96,512], index: 3, kind: output, shape index: {}]  }
   0x1   :  { %9 = vsyncpa [#allocation6], 0 }
   0x2   :  { %10 = vsyncpa [#allocation4], 0  ;;  %s856_s12 = smov [#allocation2]   ;;  %s784_s16 = scalar_lea.hbm %s997_s0, 1536 }
   0x3   :  { %s16_s13 = sshll.u32 %s856_s12, 4  ;;  %p785_p0 = scmp.ne.s32.totalorder %s997_s0, %s784_s16  ;;  %s17_s13 = int_to_ptr.vmem [resolvable:$true] %s16_s13 }
   0x4   :  { %p788_p1 = scmp.lt.u32.totalorder %s784_s16, %s997_s0 }
   0x6   :  { %p790_p2 = pnand %p788_p1, %p785_p0 }
   0x8   :  { %793 = shalt.err (!%p790_p2)
}
   0x9   :  { %s794_s21 = scalar_lea.vmem %s17_s13, 1536  ;;  %p799_p4 = scmp.lt.s32.totalorder %s17_s13, %s17_s13 }
   0xa   :  { %p795_p3 = scmp.ne.s32.totalorder %s17_s13, %s794_s21  ;;  %p800_p5 = scmp.lt.s32.totalorder %s794_s21, %s794_s21 }
   0xc   :  { %p801_p6 = por %p800_p5, %p799_p4 }
   0xe   :  { %p802_p7 = pnand %p801_p6, %p795_p3 }
  0x10   :  { %805 = shalt.err (!%p802_p7)
}
  0x11   :  { %s857_s22 = smov 128   ;;  %s858_s23 = smov 8  }
  0x12   :  { %22 = dma.hbm_to_vmem [thread:$0]  %s997_s0, 1536, %s17_s13, [#allocation3], %s857_s22, %s857_s22, %s858_s23  }
  0x13   :  { %s859_s26 = smov [#allocation5]   ;;  %s806_s30 = scalar_lea.hbm %s998_s1, 4096 }
  0x14   :  { %s28_s27 = sshll.u32 %s859_s26, 4  ;;  %p807_p8 = scmp.ne.s32.totalorder %s998_s1, %s806_s30  ;;  %s29_s27 = int_to_ptr.vmem [resolvable:$true] %s28_s27 }
  0x15   :  { %p810_p9 = scmp.lt.u32.totalorder %s806_s30, %s998_s1 }
  0x17   :  { %p812_p10 = pnand %p810_p9, %p807_p8 }
  0x19   :  { %815 = shalt.err (!%p812_p10)
}
  0x1a   :  { %s816_s8 = scalar_lea.vmem %s29_s27, 4096  ;;  %p821_p12 = scmp.lt.s32.totalorder %s29_s27, %s29_s27 }
  0x1b   :  { %p817_p11 = scmp.ne.s32.totalorder %s29_s27, %s816_s8  ;;  %p822_p13 = scmp.lt.s32.totalorder %s816_s8, %s816_s8 }
  0x1d   :  { %p823_p0 = por %p822_p13, %p821_p12 }
  0x1f   :  { %p824_p1 = pnand %p823_p0, %p817_p11 }
  0x21   :  { %827 = shalt.err (!%p824_p1)
}
  0x22   :  { %s860_s0 = smov 256   ;;  %s861_s9 = smov 16  }
  0x23   :  { %34 = dma.hbm_to_vmem [thread:$0]  %s998_s1, 4096, %s29_s27, [#allocation6], %s860_s0, %s860_s0, %s861_s9  }
  0x24   :  { %850 = dma.done.wait [#allocation3], 1536  }
  0x25   :  { %851 = vsyncadd [#allocation3], 4294965760 }
  0x26   :  { %852 = dma.done.wait [#allocation6], 4096  }
  0x27   :  { %853 = vsyncadd [#allocation6], 4294963200  ;;  %v862_v0 = vmov 0   ;;  %v736_v1 = vld [vmem:[#allocation5 + $0x4] ss:$16 sps:$4 sm:$0xff]   ;;  %v45_v34 = vld [vmem:[#allocation2 + $0x8] sm:$0xff]  ;;  %v96_v51 = vlaneseq }
  0x28   :  { %308 = vmatprep.mubr.bf16.mxu0 %v862_v0  ;;  %401 = vmatprep.mubr.bf16.mxu1 %v862_v0  ;;  %v738_v2 = vld [vmem:[#allocation5 + $0xc] ss:$16 sps:$4 sm:$0xff]   ;;  %v740_v3 = vld [vmem:[#allocation5] ss:$16 sps:$4 sm:$0xff]   ;;  %v741_v4 = vld [vmem:[#allocation5 + $0x8] ss:$16 sps:$4 sm:$0xff]  }
  0x29   :  { %276 = vmatprep.subr.bf16.mxu0 %v736_v1  ;;  %369 = vmatprep.subr.bf16.mxu1 %v738_v2  ;;  %v742_v5 = vld [vmem:[#allocation5 + $0x24] ss:$16 sps:$4 sm:$0xff]   ;;  %v744_v6 = vld [vmem:[#allocation5 + $0x2c] ss:$16 sps:$4 sm:$0xff]   ;;  %v746_v7 = vld [vmem:[#allocation5 + $0x20] ss:$16 sps:$4 sm:$0xff]  }
  0x2a   :  { %277 = vmatpush1.bf16.msra.mxu0 %v740_v3  ;;  %370 = vmatpush1.bf16.msra.mxu1 %v741_v4  ;;  %v747_v8 = vld [vmem:[#allocation5 + $0x28] ss:$16 sps:$4 sm:$0xff]   ;;  %v748_v9 = vld [vmem:[#allocation5 + $0x44] ss:$16 sps:$4 sm:$0xff]   ;;  %v750_v10 = vld [vmem:[#allocation5 + $0x4c] ss:$16 sps:$4 sm:$0xff]  }
  0x2b   :  { %278 = vmatprep.subr.bf16.mxu0 %v742_v5  ;;  %371 = vmatprep.subr.bf16.mxu1 %v744_v6  ;;  %v752_v11 = vld [vmem:[#allocation5 + $0x40] ss:$16 sps:$4 sm:$0xff]   ;;  %v753_v12 = vld [vmem:[#allocation5 + $0x48] ss:$16 sps:$4 sm:$0xff]   ;;  %v754_v13 = vld [vmem:[#allocation5 + $0x64] ss:$16 sps:$4 sm:$0xff]  }
  0x2c   :  { %v756_v14 = vld [vmem:[#allocation5 + $0x6c] ss:$16 sps:$4 sm:$0xff]   ;;  %v758_v15 = vld [vmem:[#allocation5 + $0x60] ss:$16 sps:$4 sm:$0xff]   ;;  %v759_v16 = vld [vmem:[#allocation5 + $0x68] ss:$16 sps:$4 sm:$0xff]  }
  0x2d   :  { %v760_v17 = vld [vmem:[#allocation5 + $0x84] ss:$16 sps:$4 sm:$0xff]   ;;  %v762_v18 = vld [vmem:[#allocation5 + $0x8c] ss:$16 sps:$4 sm:$0xff]   ;;  %v764_v19 = vld [vmem:[#allocation5 + $0x80] ss:$16 sps:$4 sm:$0xff]  }
  0x2e   :  { %279 = vmatpush1.bf16.msra.mxu0 %v746_v7  ;;  %372 = vmatpush1.bf16.msra.mxu1 %v747_v8  ;;  %v765_v20 = vld [vmem:[#allocation5 + $0x88] ss:$16 sps:$4 sm:$0xff]   ;;  %v766_v21 = vld [vmem:[#allocation5 + $0xa4] ss:$16 sps:$4 sm:$0xff]   ;;  %v768_v22 = vld [vmem:[#allocation5 + $0xac] ss:$16 sps:$4 sm:$0xff]  }
  0x2f   :  { %280 = vmatprep.subr.bf16.mxu0 %v748_v9  ;;  %373 = vmatprep.subr.bf16.mxu1 %v750_v10  ;;  %v770_v23 = vld [vmem:[#allocation5 + $0xa0] ss:$16 sps:$4 sm:$0xff]   ;;  %v771_v24 = vld [vmem:[#allocation5 + $0xa8] ss:$16 sps:$4 sm:$0xff]   ;;  %v772_v25 = vld [vmem:[#allocation5 + $0xc4] ss:$16 sps:$4 sm:$0xff]  }
  0x30   :  { %v774_v26 = vld [vmem:[#allocation5 + $0xcc] ss:$16 sps:$4 sm:$0xff]   ;;  %v776_v27 = vld [vmem:[#allocation5 + $0xc0] ss:$16 sps:$4 sm:$0xff]   ;;  %v777_v28 = vld [vmem:[#allocation5 + $0xc8] ss:$16 sps:$4 sm:$0xff]  }
  0x31   :  { %v778_v29 = vld [vmem:[#allocation5 + $0xe4] ss:$16 sps:$4 sm:$0xff]   ;;  %v780_v30 = vld [vmem:[#allocation5 + $0xec] ss:$16 sps:$4 sm:$0xff]   ;;  %v782_v31 = vld [vmem:[#allocation5 + $0xe0] ss:$16 sps:$4 sm:$0xff]  }
  0x32   :  { %281 = vmatpush1.bf16.msra.mxu0 %v752_v11  ;;  %374 = vmatpush1.bf16.msra.mxu1 %v753_v12  ;;  %v783_v32 = vld [vmem:[#allocation5 + $0xe8] ss:$16 sps:$4 sm:$0xff]   ;;  %v44_v33 = vld [vmem:[#allocation2] sm:$0xff]  ;;  %v46_v36 = vld [vmem:[#allocation2 + $0x10] sm:$0xff]  ;;  %v97_v52 = vshrl.u32 %v96_v51, 7 }
  0x33   :  { %282 = vmatprep.subr.bf16.mxu0 %v754_v13  ;;  %375 = vmatprep.subr.bf16.mxu1 %v756_v14  ;;  %v56_v35 = vpack.c.bf16 %v45_v34, %v44_v33  ;;  %v47_v37 = vld [vmem:[#allocation2 + $0x18] sm:$0xff]  ;;  %v48_v39 = vld [vmem:[#allocation2 + $0x20] sm:$0xff]  ;;  %v49_v40 = vld [vmem:[#allocation2 + $0x28] sm:$0xff] }
  0x34   :  { %v57_v38 = vpack.c.bf16 %v47_v37, %v46_v36  ;;  %v58_v41 = vpack.c.bf16 %v49_v40, %v48_v39  ;;  %v50_v42 = vld [vmem:[#allocation2 + $0x30] sm:$0xff]  ;;  %v51_v43 = vld [vmem:[#allocation2 + $0x38] sm:$0xff]  ;;  %v52_v45 = vld [vmem:[#allocation2 + $0x40] sm:$0xff]  ;;  %v98_v53 = vsub.s32 0, %v97_v52  ;;  %v106_v54 = vsub.s32 2, %v97_v52 }
  0x35   :  { %v59_v44 = vpack.c.bf16 %v51_v43, %v50_v42  ;;  %v53_v46 = vld [vmem:[#allocation2 + $0x48] sm:$0xff]  ;;  %v54_v48 = vld [vmem:[#allocation2 + $0x50] sm:$0xff]  ;;  %v55_v49 = vld [vmem:[#allocation2 + $0x58] sm:$0xff]  ;;  %v102_v56 = vsub.s32 1, %v97_v52  ;;  %v110_v57 = vsub.s32 3, %v97_v52 }
  0x36   :  { %283 = vmatpush1.bf16.msra.mxu0 %v758_v15  ;;  %376 = vmatpush1.bf16.msra.mxu1 %v759_v16  ;;  %v60_v47 = vpack.c.bf16 %v53_v46, %v52_v45  ;;  %v61_v50 = vpack.c.bf16 %v55_v49, %v54_v48  ;;  %v94_v55 = vld [vmem:[%s999_s2] sm:$0xf]  ;;  %s863_s2 = smov [#allocation7]  }
  0x37   :  { %284 = vmatprep.subr.bf16.mxu0 %v760_v17  ;;  %377 = vmatprep.subr.bf16.mxu1 %v762_v18  ;;  %v926_v58 = vrot.slane %v94_v55, %v98_v53  ;;  %v928_v59 = vrot.slane %v94_v55, %v106_v54  ;;  %v930_v60 = vrot.slane %v94_v55, %v102_v56  ;;  %s635_s13 = sshll.u32 %s863_s2, 4  ;;  %s636_s13 = int_to_ptr.vmem [resolvable:$true] %s635_s13 }
  0x38   :  { %v932_v61 = vrot.slane %v94_v55, %v110_v57  ;;  %s828_s14 = scalar_lea.vmem %s636_s13, 3072  ;;  %p833_p3 = scmp.lt.s32.totalorder %s636_s13, %s636_s13 }
  0x39   :  { %p829_p2 = scmp.ne.s32.totalorder %s636_s13, %s828_s14  ;;  %p834_p4 = scmp.lt.s32.totalorder %s828_s14, %s828_s14 }
  0x3a   :  { %285 = vmatpush1.bf16.msra.mxu0 %v764_v19  ;;  %378 = vmatpush1.bf16.msra.mxu1 %v765_v20 }
  0x3b   :  { %286 = vmatprep.subr.bf16.mxu0 %v766_v21  ;;  %379 = vmatprep.subr.bf16.mxu1 %v768_v22  ;;  %p835_p5 = por %p834_p4, %p833_p3 }
  0x3d   :  { %p836_p6 = pnand %p835_p5, %p829_p2 }
  0x3e   :  { %287 = vmatpush1.bf16.msra.mxu0 %v770_v23  ;;  %380 = vmatpush1.bf16.msra.mxu1 %v771_v24 }
  0x3f   :  { %288 = vmatprep.subr.bf16.mxu0 %v772_v25  ;;  %381 = vmatprep.subr.bf16.mxu1 %v774_v26 }
  0x42   :  { %289 = vmatpush1.bf16.msra.mxu0 %v776_v27  ;;  %382 = vmatpush1.bf16.msra.mxu1 %v777_v28 }
  0x43   :  { %290 = vmatprep.subr.bf16.mxu0 %v778_v29  ;;  %383 = vmatprep.subr.bf16.mxu1 %v780_v30 }
  0x46   :  { %291 = vmatpush1.bf16.msra.mxu0 %v782_v31  ;;  %384 = vmatpush1.bf16.msra.mxu1 %v783_v32 }
  0x49   :  { %309 = vmatmul.mubr.bf16.vlgmr.msra.gmra.mrb[0].mxu0 %v56_v35  ;;  %402 = vmatmul.mubr.bf16.vlgmr.msra.gmra.mrb[0].mxu1 %v56_v35 }
  0x4a   :  { %318 = vmatprep.mubr.bf16.mxu0 %v862_v0  ;;  %411 = vmatprep.mubr.bf16.mxu1 %v862_v0 }
  0x51   :  { %319 = vmatmul.mubr.bf16.gmra.mrb[4].mxu0 %v57_v38  ;;  %412 = vmatmul.mubr.bf16.gmra.mrb[4].mxu1 %v57_v38 }
  0x52   :  { %328 = vmatprep.mubr.bf16.mxu0 %v862_v0  ;;  %421 = vmatprep.mubr.bf16.mxu1 %v862_v0 }
  0x59   :  { %329 = vmatmul.mubr.bf16.gmra.mrb[8].mxu0 %v58_v41  ;;  %422 = vmatmul.mubr.bf16.gmra.mrb[8].mxu1 %v58_v41 }
  0x5a   :  { %338 = vmatprep.mubr.bf16.mxu0 %v862_v0  ;;  %431 = vmatprep.mubr.bf16.mxu1 %v862_v0 }
  0x61   :  { %339 = vmatmul.mubr.bf16.gmra.mrb[12].mxu0 %v59_v44  ;;  %432 = vmatmul.mubr.bf16.gmra.mrb[12].mxu1 %v59_v44 }
  0x62   :  { %348 = vmatprep.mubr.bf16.mxu0 %v862_v0  ;;  %441 = vmatprep.mubr.bf16.mxu1 %v862_v0 }
  0x69   :  { %349 = vmatmul.mubr.bf16.gmra.mrb[16].mxu0 %v60_v47  ;;  %442 = vmatmul.mubr.bf16.gmra.mrb[16].mxu1 %v60_v47 }
  0x6a   :  { %358 = vmatprep.mubr.bf16.mxu0 %v862_v0  ;;  %451 = vmatprep.mubr.bf16.mxu1 %v862_v0 }
  0x71   :  { %359 = vmatmul.mubr.bf16.gmra.mrb[20].mxu0 %v61_v50  ;;  %452 = vmatmul.mubr.bf16.gmra.mrb[20].mxu1 %v61_v50 }
 0x11c   :  { %v310_v62 = vpop.f32.mrb[0].mxu0  ;;  %v403_v63 = vpop.f32.mrb[0].mxu1 }
 0x11d   :  { %v311_v0 = vadd.f32 %v310_v62, %v926_v58  ;;  %v404_v1 = vadd.f32 %v403_v63, %v928_v59  ;;  %v312_v2 = vpop.f32.mrb[1].mxu0  ;;  %v405_v3 = vpop.f32.mrb[1].mxu1 }
 0x11e   :  { %v313_v4 = vadd.f32 %v312_v2, %v930_v60  ;;  %v406_v5 = vadd.f32 %v405_v3, %v932_v61  ;;  %v314_v6 = vpop.f32.mrb[2].mxu0  ;;  %v407_v7 = vpop.f32.mrb[2].mxu1 }
 0x11f   :  { %v315_v8 = vadd.f32 %v314_v6, %v926_v58  ;;  %v408_v9 = vadd.f32 %v407_v7, %v928_v59  ;;  %v316_v10 = vpop.f32.mrb[3].mxu0  ;;  %v409_v11 = vpop.f32.mrb[3].mxu1 }
 0x120   :  { %v704_v12 = vpack.c.bf16 %v313_v4, %v311_v0  ;;  %v705_v13 = vpack.c.bf16 %v406_v5, %v404_v1  ;;  %v317_v14 = vadd.f32 %v316_v10, %v930_v60  ;;  %v410_v15 = vadd.f32 %v409_v11, %v932_v61 }
 0x122   :  { %606 = vst [vmem:[#allocation7] sm:$0xff] %v704_v12  ;;  %607 = vst [vmem:[#allocation7 + $0x8] sm:$0xff] %v705_v13  ;;  %v706_v16 = vpack.c.bf16 %v317_v14, %v315_v8  ;;  %v707_v17 = vpack.c.bf16 %v410_v15, %v408_v9 }
 0x124   :  { %608 = vst [vmem:[#allocation7 + $0x10] sm:$0xff] %v706_v16  ;;  %609 = vst [vmem:[#allocation7 + $0x18] sm:$0xff] %v707_v17  ;;  %v320_v18 = vpop.f32.mrb[4].mxu0  ;;  %v413_v19 = vpop.f32.mrb[4].mxu1 }
 0x125   :  { %v321_v20 = vadd.f32 %v320_v18, %v926_v58  ;;  %v414_v21 = vadd.f32 %v413_v19, %v928_v59  ;;  %v322_v22 = vpop.f32.mrb[5].mxu0  ;;  %v415_v23 = vpop.f32.mrb[5].mxu1 }
 0x126   :  { %v323_v24 = vadd.f32 %v322_v22, %v930_v60  ;;  %v416_v25 = vadd.f32 %v415_v23, %v932_v61  ;;  %v324_v26 = vpop.f32.mrb[6].mxu0  ;;  %v417_v27 = vpop.f32.mrb[6].mxu1 }
 0x127   :  { %v325_v28 = vadd.f32 %v324_v26, %v926_v58  ;;  %v418_v29 = vadd.f32 %v417_v27, %v928_v59  ;;  %v326_v30 = vpop.f32.mrb[7].mxu0  ;;  %v419_v31 = vpop.f32.mrb[7].mxu1 }
 0x128   :  { %v708_v32 = vpack.c.bf16 %v323_v24, %v321_v20  ;;  %v709_v33 = vpack.c.bf16 %v416_v25, %v414_v21  ;;  %v327_v34 = vadd.f32 %v326_v30, %v930_v60  ;;  %v420_v35 = vadd.f32 %v419_v31, %v932_v61 }
 0x12a   :  { %610 = vst [vmem:[#allocation7 + $0x20] sm:$0xff] %v708_v32  ;;  %611 = vst [vmem:[#allocation7 + $0x28] sm:$0xff] %v709_v33  ;;  %v710_v36 = vpack.c.bf16 %v327_v34, %v325_v28  ;;  %v711_v37 = vpack.c.bf16 %v420_v35, %v418_v29 }
 0x12c   :  { %612 = vst [vmem:[#allocation7 + $0x30] sm:$0xff] %v710_v36  ;;  %613 = vst [vmem:[#allocation7 + $0x38] sm:$0xff] %v711_v37  ;;  %v330_v38 = vpop.f32.mrb[8].mxu0  ;;  %v423_v39 = vpop.f32.mrb[8].mxu1 }
 0x12d   :  { %v331_v40 = vadd.f32 %v330_v38, %v926_v58  ;;  %v424_v41 = vadd.f32 %v423_v39, %v928_v59  ;;  %v332_v42 = vpop.f32.mrb[9].mxu0  ;;  %v425_v43 = vpop.f32.mrb[9].mxu1 }
 0x12e   :  { %v333_v44 = vadd.f32 %v332_v42, %v930_v60  ;;  %v426_v45 = vadd.f32 %v425_v43, %v932_v61  ;;  %v334_v46 = vpop.f32.mrb[10].mxu0  ;;  %v427_v47 = vpop.f32.mrb[10].mxu1 }
 0x12f   :  { %v335_v48 = vadd.f32 %v334_v46, %v926_v58  ;;  %v428_v49 = vadd.f32 %v427_v47, %v928_v59  ;;  %v336_v50 = vpop.f32.mrb[11].mxu0  ;;  %v429_v51 = vpop.f32.mrb[11].mxu1 }
 0x130   :  { %v712_v52 = vpack.c.bf16 %v333_v44, %v331_v40  ;;  %v713_v53 = vpack.c.bf16 %v426_v45, %v424_v41  ;;  %v337_v54 = vadd.f32 %v336_v50, %v930_v60  ;;  %v430_v55 = vadd.f32 %v429_v51, %v932_v61 }
 0x132   :  { %614 = vst [vmem:[#allocation7 + $0x40] sm:$0xff] %v712_v52  ;;  %615 = vst [vmem:[#allocation7 + $0x48] sm:$0xff] %v713_v53  ;;  %v714_v56 = vpack.c.bf16 %v337_v54, %v335_v48  ;;  %v715_v57 = vpack.c.bf16 %v430_v55, %v428_v49 }
 0x134   :  { %616 = vst [vmem:[#allocation7 + $0x50] sm:$0xff] %v714_v56  ;;  %617 = vst [vmem:[#allocation7 + $0x58] sm:$0xff] %v715_v57  ;;  %v340_v62 = vpop.f32.mrb[12].mxu0  ;;  %v433_v63 = vpop.f32.mrb[12].mxu1 }
 0x135   :  { %v341_v0 = vadd.f32 %v340_v62, %v926_v58  ;;  %v434_v1 = vadd.f32 %v433_v63, %v928_v59  ;;  %v342_v2 = vpop.f32.mrb[13].mxu0  ;;  %v435_v3 = vpop.f32.mrb[13].mxu1 }
 0x136   :  { %v343_v4 = vadd.f32 %v342_v2, %v930_v60  ;;  %v436_v5 = vadd.f32 %v435_v3, %v932_v61  ;;  %v344_v6 = vpop.f32.mrb[14].mxu0  ;;  %v437_v7 = vpop.f32.mrb[14].mxu1 }
 0x137   :  { %v345_v8 = vadd.f32 %v344_v6, %v926_v58  ;;  %v438_v9 = vadd.f32 %v437_v7, %v928_v59  ;;  %v346_v10 = vpop.f32.mrb[15].mxu0  ;;  %v439_v11 = vpop.f32.mrb[15].mxu1 }
 0x138   :  { %v716_v12 = vpack.c.bf16 %v343_v4, %v341_v0  ;;  %v717_v13 = vpack.c.bf16 %v436_v5, %v434_v1  ;;  %v347_v14 = vadd.f32 %v346_v10, %v930_v60  ;;  %v440_v15 = vadd.f32 %v439_v11, %v932_v61 }
 0x13a   :  { %618 = vst [vmem:[#allocation7 + $0x60] sm:$0xff] %v716_v12  ;;  %619 = vst [vmem:[#allocation7 + $0x68] sm:$0xff] %v717_v13  ;;  %v718_v16 = vpack.c.bf16 %v347_v14, %v345_v8  ;;  %v719_v17 = vpack.c.bf16 %v440_v15, %v438_v9 }
 0x13c   :  { %620 = vst [vmem:[#allocation7 + $0x70] sm:$0xff] %v718_v16  ;;  %621 = vst [vmem:[#allocation7 + $0x78] sm:$0xff] %v719_v17  ;;  %v350_v18 = vpop.f32.mrb[16].mxu0  ;;  %v443_v19 = vpop.f32.mrb[16].mxu1 }
 0x13d   :  { %v351_v20 = vadd.f32 %v350_v18, %v926_v58  ;;  %v444_v21 = vadd.f32 %v443_v19, %v928_v59  ;;  %v352_v22 = vpop.f32.mrb[17].mxu0  ;;  %v445_v23 = vpop.f32.mrb[17].mxu1 }
 0x13e   :  { %v353_v24 = vadd.f32 %v352_v22, %v930_v60  ;;  %v446_v25 = vadd.f32 %v445_v23, %v932_v61  ;;  %v354_v26 = vpop.f32.mrb[18].mxu0  ;;  %v447_v27 = vpop.f32.mrb[18].mxu1 }
 0x13f   :  { %v355_v28 = vadd.f32 %v354_v26, %v926_v58  ;;  %v448_v29 = vadd.f32 %v447_v27, %v928_v59  ;;  %v356_v30 = vpop.f32.mrb[19].mxu0  ;;  %v449_v31 = vpop.f32.mrb[19].mxu1 }
 0x140   :  { %v720_v32 = vpack.c.bf16 %v353_v24, %v351_v20  ;;  %v721_v33 = vpack.c.bf16 %v446_v25, %v444_v21  ;;  %v357_v34 = vadd.f32 %v356_v30, %v930_v60  ;;  %v450_v35 = vadd.f32 %v449_v31, %v932_v61 }
 0x142   :  { %622 = vst [vmem:[#allocation7 + $0x80] sm:$0xff] %v720_v32  ;;  %623 = vst [vmem:[#allocation7 + $0x88] sm:$0xff] %v721_v33  ;;  %v722_v36 = vpack.c.bf16 %v357_v34, %v355_v28  ;;  %v723_v37 = vpack.c.bf16 %v450_v35, %v448_v29 }
 0x144   :  { %624 = vst [vmem:[#allocation7 + $0x90] sm:$0xff] %v722_v36  ;;  %625 = vst [vmem:[#allocation7 + $0x98] sm:$0xff] %v723_v37  ;;  %v360_v38 = vpop.f32.mrb[20].mxu0  ;;  %v453_v39 = vpop.f32.mrb[20].mxu1 }
 0x145   :  { %v361_v40 = vadd.f32 %v360_v38, %v926_v58  ;;  %v454_v41 = vadd.f32 %v453_v39, %v928_v59  ;;  %v362_v42 = vpop.f32.mrb[21].mxu0  ;;  %v455_v43 = vpop.f32.mrb[21].mxu1 }
 0x146   :  { %v363_v44 = vadd.f32 %v362_v42, %v930_v60  ;;  %v456_v45 = vadd.f32 %v455_v43, %v932_v61  ;;  %v364_v46 = vpop.f32.mrb[22].mxu0  ;;  %v457_v47 = vpop.f32.mrb[22].mxu1 }
 0x147   :  { %v365_v48 = vadd.f32 %v364_v46, %v926_v58  ;;  %v458_v49 = vadd.f32 %v457_v47, %v928_v59  ;;  %v366_v50 = vpop.f32.mrb[23].mxu0  ;;  %v459_v51 = vpop.f32.mrb[23].mxu1 }
 0x148   :  { %v724_v52 = vpack.c.bf16 %v363_v44, %v361_v40  ;;  %v725_v53 = vpack.c.bf16 %v456_v45, %v454_v41  ;;  %v367_v54 = vadd.f32 %v366_v50, %v930_v60  ;;  %v460_v55 = vadd.f32 %v459_v51, %v932_v61 }
 0x14a   :  { %626 = vst [vmem:[#allocation7 + $0xa0] sm:$0xff] %v724_v52  ;;  %627 = vst [vmem:[#allocation7 + $0xa8] sm:$0xff] %v725_v53  ;;  %v726_v56 = vpack.c.bf16 %v367_v54, %v365_v48  ;;  %v727_v57 = vpack.c.bf16 %v460_v55, %v458_v49 }
 0x14c   :  { %628 = vst [vmem:[#allocation7 + $0xb0] sm:$0xff] %v726_v56  ;;  %629 = vst [vmem:[#allocation7 + $0xb8] sm:$0xff] %v727_v57 }
 0x14d   :  { %839 = shalt.err (!%p836_p6)
}
 0x14e   :  { %s840_s17 = scalar_lea.hbm %s1000_s3, 3072 }
 0x14f   :  { %p841_p7 = scmp.ne.s32.totalorder %s1000_s3, %s840_s17  ;;  %p844_p8 = scmp.lt.u32.totalorder %s840_s17, %s1000_s3 }
 0x151   :  { %p846_p9 = pnand %p844_p8, %p841_p7 }
 0x153   :  { %849 = shalt.err (!%p846_p9)
}
 0x154   :  { %641 = dma.vmem_to_hbm [thread:$0]  %s636_s13, 3072, %s1000_s3, [#allocation4], %s860_s0, %s860_s0, %s861_s9  }
 0x155   :  { %854 = dma.done.wait [#allocation4], 3072  }
 0x156   :  { %855 = vsyncadd [#allocation4], 4294964224 }
 0x157   :  { %645 = vsyncpa [#allocation3], 1 }
 0x158   :  { %646 = vsyncpa [#allocation6], 1 }
 0x159   :  { %647 = vsyncpa [#allocation4], 1 }

</bundles_post_ra>
